<compile_context>
chip_gen: v5e
topology: v5e:2x2
jax: 0.10.0
libtpu: 0.0.40
codegen_flags: <defaults>
</compile_context>

<pallas_src>
import functools

import jax
import jax.numpy as jnp
from jax.experimental import pallas as pl
from jax.experimental.pallas import tpu as pltpu


def _round_up(x, m):
    return (x + m - 1) // m * m


def _patch_embed_kernel(x_ref, w_ref, b_ref, g_ref, beta_ref, o_ref, *, inv_e, eps):
    # x_ref:    (TM, K)  patches (bf16 or f32)
    # w_ref:    (K, E)   flattened conv weight (same dtype as x)
    # b_ref:    (1, E)   conv bias  (f32)
    # g_ref:    (1, E)   LN gamma   (f32)
    # beta_ref: (1, E)   LN beta    (f32)
    # o_ref:    (TM, E)  output (bf16 or f32); masked lane stores when E < 128
    y = jnp.dot(x_ref[...], w_ref[...], preferred_element_type=jnp.float32)
    y = y + b_ref[...]

    # Two-pass LayerNorm over the true embedding dim (memory-bound kernel, so
    # the extra pass is free; avoids catastrophic cancellation of E[y^2]-mu^2).
    mean = jnp.sum(y, axis=-1, keepdims=True) * inv_e
    yc = y - mean
    var = jnp.sum(yc * yc, axis=-1, keepdims=True) * inv_e
    y_hat = yc * jax.lax.rsqrt(var + eps)

    o_ref[...] = (y_hat * g_ref[...] + beta_ref[...]).astype(o_ref.dtype)


def patch_partition(x, conv_w, conv_b, ln_g, ln_b, patch_size, *,
                    compute_dtype=jnp.bfloat16, out_dtype=jnp.bfloat16,
                    tm=2048):
    """x: (B, C, H, W) NCHW float32.  Returns (B, L, E) in out_dtype.

    tm: row-tile size (rows = patches).  Default 2048; clamped to M, rounded
    to a multiple of 16, and shrunk if needed so the grid has >= 2 steps
    (keeps both v7x TensorCores busy).
    """
    B, C, H, W = x.shape
    p = patch_size
    E = conv_w.shape[0]
    Hp, Wp = H // p, W // p
    L = Hp * Wp
    K = C * p * p          # NOTE: deliberately NOT padded to 128 (HBM-bound).
    M = B * L

    # Unfold non-overlapping p x p patches into (M, K), flattened in
    # (c, kh, kw) order to match the Conv2d weight layout (E, C, p, p).
    # Cast to the matmul dtype *before* the relayout so even an unfused
    # fallback moves half the bytes; with allow_input_fusion XLA may fuse the
    # whole producer into the kernel's input DMA.
    patches = x.astype(compute_dtype).reshape(B, C, Hp, p, Wp, p)
    patches = jnp.transpose(patches, (0, 2, 4, 1, 3, 5)).reshape(M, K)

    # Conv2d weight (E, C, p, p) -> (K, E); LN / bias params as (1, E) f32.
    w = conv_w.reshape(E, K).T.astype(compute_dtype)
    b = conv_b.astype(jnp.float32).reshape(1, E)
    g = ln_g.astype(jnp.float32).reshape(1, E)
    beta = ln_b.astype(jnp.float32).reshape(1, E)

    # Row tiling: as large as requested (multiple of 16 for bf16 sublane
    # packing), but guarantee >= 2 grid steps when M allows so the "parallel"
    # axis can be split across both v7x TensorCores.
    tm_eff = _round_up(max(16, min(tm, M)), 16)
    if M > 16 and pl.cdiv(M, tm_eff) < 2:
        tm_eff = _round_up(pl.cdiv(M, 2), 16)
    grid = (pl.cdiv(M, tm_eff),)

    # Explicit VMEM budget: double-buffered streaming tiles (patches + output)
    # plus the (default double-buffered) resident params, plus fixed headroom.
    # Capped at 64 MiB so it also fits v7x's smaller VMEM.
    in_isz = jnp.dtype(compute_dtype).itemsize
    out_isz = jnp.dtype(out_dtype).itemsize
    stream_bytes = 2 * tm_eff * (K * in_isz + E * out_isz)
    resident_bytes = 2 * (K * E * in_isz + 3 * E * 4)
    vmem_limit = int(min(max(stream_bytes + resident_bytes + (4 << 20), 16 << 20),
                         64 << 20))

    kernel = functools.partial(_patch_embed_kernel, inv_e=1.0 / E, eps=1e-5)

    # If xprof ever shows exposed DMA at step boundaries, consider
    # pipeline_mode=pl.Buffered(3) on the patches spec (VMEM has headroom).
    out = pl.pallas_call(
        kernel,
        out_shape=jax.ShapeDtypeStruct((M, E), out_dtype),
        grid_spec=pltpu.PrefetchScalarGridSpec(
            num_scalar_prefetch=0,
            grid=grid,
            in_specs=[
                pl.BlockSpec((tm_eff, K), lambda i: (i, 0)),   # patches tile
                pl.BlockSpec((K, E), lambda i: (0, 0)),        # weight (resident)
                pl.BlockSpec((1, E), lambda i: (0, 0)),        # bias
                pl.BlockSpec((1, E), lambda i: (0, 0)),        # gamma
                pl.BlockSpec((1, E), lambda i: (0, 0)),        # beta
            ],
            out_specs=pl.BlockSpec((tm_eff, E), lambda i: (i, 0)),
        ),
        compiler_params=pltpu.CompilerParams(
            dimension_semantics=("parallel",),   # row tiles across TCs on v7x
            vmem_limit_bytes=vmem_limit,
            allow_input_fusion=[True, False, False, False, False],
        ),
    )(patches, w, b, g, beta)

    # (M, E) -> (B, L, E) is a free metadata reshape (no pad lanes to slice).
    return out.reshape(B, L, E)


if __name__ == "__main__":
    # Small config consistent with the module: img=16, patch=4, C=4, E=32, B=2.
    img_size, patch_size, in_channels, embedding_dim, batch = 16, 4, 4, 32, 2

    key = jax.random.PRNGKey(0)
    k_x, k_w, k_b, k_g, k_beta = jax.random.split(key, 5)

    x = jax.random.normal(
        k_x, (batch, in_channels, img_size, img_size), dtype=jnp.float32)
    conv_w = jax.random.normal(
        k_w, (embedding_dim, in_channels, patch_size, patch_size),
        dtype=jnp.float32) * 0.02
    conv_b = jax.random.normal(k_b, (embedding_dim,), dtype=jnp.float32) * 0.02
    ln_g = jnp.ones((embedding_dim,), dtype=jnp.float32)
    ln_b = jnp.zeros((embedding_dim,), dtype=jnp.float32)

    # Default tm=2048 gets clamped by the >=2-grid-step rule to 16 at this tiny
    # demo size, which also exercises the multi-step pipelined grid.
    out = patch_partition(x, conv_w, conv_b, ln_g, ln_b, patch_size)
    jax.block_until_ready(out)

    # Pure-JAX reference: same bf16 matmul inputs, f32 accumulation and f32 LN.
    B, C, H, W = x.shape
    p = patch_size
    Hp, Wp = H // p, W // p
    xb = x.astype(jnp.bfloat16)
    pr = xb.reshape(B, C, Hp, p, Wp, p)
    pr = jnp.transpose(pr, (0, 2, 4, 1, 3, 5)).reshape(B * Hp * Wp, C * p * p)
    wr = conv_w.reshape(embedding_dim, -1).T.astype(jnp.bfloat16)
    y = jnp.dot(pr, wr, preferred_element_type=jnp.float32) + conv_b
    mean = y.mean(-1, keepdims=True)
    var = ((y - mean) ** 2).mean(-1, keepdims=True)
    ref = ((y - mean) * jax.lax.rsqrt(var + 1e-5) * ln_g + ln_b)
    ref = ref.reshape(batch, Hp * Wp, embedding_dim)

    assert out.shape == (batch, Hp * Wp, embedding_dim)
    # Kernel output is bf16 (per perf review); compare with bf16-level tolerance.
    assert jnp.allclose(out.astype(jnp.float32), ref, atol=2e-2, rtol=2e-2)
    print("KERNEL_OK")
</pallas_src>

<mosaic_0001>
module attributes {stable_mosaic.version = 11 : i64} {
  func.func @_patch_embed_kernel(%arg0: i32, %arg1: memref<16x64xbf16, #tpu.memory_space<vmem>>, %arg2: memref<64x32xbf16, #tpu.memory_space<vmem>>, %arg3: memref<1x32xf32, #tpu.memory_space<vmem>>, %arg4: memref<1x32xf32, #tpu.memory_space<vmem>>, %arg5: memref<1x32xf32, #tpu.memory_space<vmem>>, %arg6: memref<16x32xbf16, #tpu.memory_space<vmem>>) attributes {dimension_semantics = [#tpu.dimension_semantics<parallel>], iteration_bounds = array<i64: 2>, scalar_prefetch = 0 : i64, scratch_operands = 0 : i64, tpu.core_type = #tpu.core_type<tc>, window_params = [{transform_indices = @transform_0, window_bounds = array<i64: 16, 64>}, {pipeline_mode = #tpu.pipeline_mode<synchronous>, transform_indices = @transform_1, window_bounds = array<i64: 64, 32>}, {pipeline_mode = #tpu.pipeline_mode<synchronous>, transform_indices = @transform_2, window_bounds = array<i64: 1, 32>}, {pipeline_mode = #tpu.pipeline_mode<synchronous>, transform_indices = @transform_3, window_bounds = array<i64: 1, 32>}, {pipeline_mode = #tpu.pipeline_mode<synchronous>, transform_indices = @transform_4, window_bounds = array<i64: 1, 32>}, {transform_indices = @transform_5, window_bounds = array<i64: 16, 32>}]} {
    %c0 = arith.constant 0 : index
    %c0_0 = arith.constant 0 : index
    %0 = vector.load %arg1[%c0, %c0_0] : memref<16x64xbf16, #tpu.memory_space<vmem>>, vector<16x64xbf16>
    %c0_1 = arith.constant 0 : index
    %c0_2 = arith.constant 0 : index
    %1 = vector.load %arg2[%c0_1, %c0_2] : memref<64x32xbf16, #tpu.memory_space<vmem>>, vector<64x32xbf16>
    %cst = arith.constant dense<0.000000e+00> : vector<16x32xf32>
    %2 = tpu.matmul %0, %1, %cst {dimension_numbers = #tpu.dot_dimension_numbers<[1], [0], [0], [1], [0, 0, 1, 1], [], []>} : vector<16x64xbf16>, vector<64x32xbf16>, vector<16x32xf32> -> vector<16x32xf32>
    %c0_3 = arith.constant 0 : index
    %c0_4 = arith.constant 0 : index
    %3 = vector.load %arg3[%c0_3, %c0_4] : memref<1x32xf32, #tpu.memory_space<vmem>>, vector<1x32xf32>
    %4 = vector.broadcast %3 : vector<1x32xf32> to vector<16x32xf32>
    %5 = arith.addf %2, %4 : vector<16x32xf32>
    %cst_5 = arith.constant dense<0.000000e+00> : vector<16xf32>
    %6 = vector.multi_reduction <add>, %5, %cst_5 [1] : vector<16x32xf32> to vector<16xf32>
    %7 = vector.shape_cast %6 : vector<16xf32> to vector<16x1xf32>
    %cst_6 = arith.constant 3.125000e-02 : f32
    %8 = vector.broadcast %cst_6 : f32 to vector<16x1xf32>
    %9 = arith.mulf %7, %8 : vector<16x1xf32>
    %10 = vector.broadcast %9 : vector<16x1xf32> to vector<16x32xf32>
    %11 = arith.subf %5, %10 : vector<16x32xf32>
    %12 = arith.mulf %11, %11 : vector<16x32xf32>
    %cst_7 = arith.constant dense<0.000000e+00> : vector<16xf32>
    %13 = vector.multi_reduction <add>, %12, %cst_7 [1] : vector<16x32xf32> to vector<16xf32>
    %14 = vector.shape_cast %13 : vector<16xf32> to vector<16x1xf32>
    %cst_8 = arith.constant 3.125000e-02 : f32
    %15 = vector.broadcast %cst_8 : f32 to vector<16x1xf32>
    %16 = arith.mulf %14, %15 : vector<16x1xf32>
    %cst_9 = arith.constant 9.99999974E-6 : f32
    %17 = vector.broadcast %cst_9 : f32 to vector<16x1xf32>
    %18 = arith.addf %16, %17 : vector<16x1xf32>
    %19 = math.rsqrt %18 : vector<16x1xf32>
    %20 = vector.broadcast %19 : vector<16x1xf32> to vector<16x32xf32>
    %21 = arith.mulf %11, %20 : vector<16x32xf32>
    %c0_10 = arith.constant 0 : index
    %c0_11 = arith.constant 0 : index
    %22 = vector.load %arg4[%c0_10, %c0_11] : memref<1x32xf32, #tpu.memory_space<vmem>>, vector<1x32xf32>
    %23 = vector.broadcast %22 : vector<1x32xf32> to vector<16x32xf32>
    %24 = arith.mulf %21, %23 : vector<16x32xf32>
    %c0_12 = arith.constant 0 : index
    %c0_13 = arith.constant 0 : index
    %25 = vector.load %arg5[%c0_12, %c0_13] : memref<1x32xf32, #tpu.memory_space<vmem>>, vector<1x32xf32>
    %26 = vector.broadcast %25 : vector<1x32xf32> to vector<16x32xf32>
    %27 = arith.addf %24, %26 : vector<16x32xf32>
    %28 = arith.truncf %27 : vector<16x32xf32> to vector<16x32xbf16>
    %c0_14 = arith.constant 0 : index
    %c0_15 = arith.constant 0 : index
    %29 = vector.load %arg6[%c0_14, %c0_15] : memref<16x32xbf16, #tpu.memory_space<vmem>>, vector<16x32xbf16>
    tpu.vector_store %arg6[%c0_14, %c0_15], %28 {strides = array<i32>} : memref<16x32xbf16, #tpu.memory_space<vmem>>, vector<16x32xbf16>,
    return
  }
  func.func @transform_0(%arg0: i32) -> (i32, i32) {
    %c0_i32 = arith.constant 0 : i32
    %c0_i32_0 = arith.constant 0 : i32
    return %arg0, %c0_i32 : i32, i32
  }
  func.func @transform_1(%arg0: i32) -> (i32, i32) {
    %c0_i32 = arith.constant 0 : i32
    %c0_i32_0 = arith.constant 0 : i32
    %c0_i32_1 = arith.constant 0 : i32
    return %c0_i32, %c0_i32_0 : i32, i32
  }
  func.func @transform_2(%arg0: i32) -> (i32, i32) {
    %c0_i32 = arith.constant 0 : i32
    %c0_i32_0 = arith.constant 0 : i32
    %c0_i32_1 = arith.constant 0 : i32
    return %c0_i32, %c0_i32_0 : i32, i32
  }
  func.func @transform_3(%arg0: i32) -> (i32, i32) {
    %c0_i32 = arith.constant 0 : i32
    %c0_i32_0 = arith.constant 0 : i32
    %c0_i32_1 = arith.constant 0 : i32
    return %c0_i32, %c0_i32_0 : i32, i32
  }
  func.func @transform_4(%arg0: i32) -> (i32, i32) {
    %c0_i32 = arith.constant 0 : i32
    %c0_i32_0 = arith.constant 0 : i32
    %c0_i32_1 = arith.constant 0 : i32
    return %c0_i32, %c0_i32_0 : i32, i32
  }
  func.func @transform_5(%arg0: i32) -> (i32, i32) {
    %c0_i32 = arith.constant 0 : i32
    %c0_i32_0 = arith.constant 0 : i32
    return %arg0, %c0_i32 : i32, i32
  }
}

</mosaic_0001>

<bundles_post_ra>
// kernel: tpu_custom_call.1
= control target key start
LH: loop header
LB: loop body
LE: loop exit
PB: predicated region body
PF: predicated region fallthrough
CT: control target
= control target key end

     0   :  { %10 = vsyncpa [#allocation3], 0  ;;  %s720_s0 = inlined_call_operand.vmem [shape: bf16[32,64], index: 0, kind: input, shape index: {}]   ;;  %s721_s1 = inlined_call_operand.vmem [shape: bf16[64,32], index: 1, kind: input, shape index: {}]   ;;  %s722_s2 = inlined_call_operand.vmem [shape: f32[1,32], index: 2, kind: input, shape index: {}]   ;;  %s723_s3 = inlined_call_operand.vmem [shape: f32[1,32], index: 3, kind: input, shape index: {}]   ;;  %s724_s4 = inlined_call_operand.vmem [shape: f32[1,32], index: 4, kind: input, shape index: {}]   ;;  %s725_s5 = inlined_call_operand.hbm [shape: bf16[32,32], index: 5, kind: output, shape index: {}]  }
   0x1   :  { %12 = vsyncpa [#allocation3 + $0x1], 0  ;;  %s611_s18 = smov 0   ;;  %s613_s19 = smov 0  }
   0x2   :  { %s615_s20 = smov 0   ;;  %s617_s21 = smov 0  }
   0x3 LB: > { %s632_s22 = sadd.s32 4294967295, %s577_s21   ;;  %s428_s23 = sadd.s32 4294967294, %s577_s21   ;;  %s577_s21 = sphi %s617_s21, %s731_s21   ;;  %s573_s20 = sphi %s615_s20, %s730_s20   ;;  %s569_s19 = sphi %s613_s19, %s729_s19   ;;  %s565_s18 = sphi %s611_s18, %s728_s18  }
   0x4   : > { %s636_s24 = sadd.s32 1, %s577_s21   ;;  %s135_s25 = sadd.s32 1, %s573_s20 }
   0x5   : > { %s132_s26 = ssub.s32 %s577_s21, %s636_s24  ;;  %p145_p0 = scmp.ne.s32.totalorder %s573_s20, %s569_s19 }
   0x6   : > { %p133_p1 = scmp.eq.s32.totalorder %s132_s26, 0  ;;  %p146_p2 = scmp.eq.s32.totalorder %s632_s22, 1 }
   0x7   : > { %p151_p3 = scmp.ne.s32.totalorder %s569_s19, %s565_s18  ;;  %p152_p4 = scmp.eq.s32.totalorder %s428_s23, 1 }
   0x8   : > { %s647_s27 = scalar_select %p133_p1, %s573_s20, %s135_s25  }
   0x9   : > { %p649_p5 = por %p146_p2, %p145_p0  ;;  %p653_p6 = por %p152_p4, %p151_p3 }
   0xa   : > { %p431_p7 = scmp.ge.s32.totalorder %s577_s21, 1  ;;  %p191_p8 = scmp.lt.s32.totalorder %s577_s21, 3 }
   0xc   : > { %p192_p9 = pnand %p431_p7, %p191_p8 }
   0xd   : > { %s433_s7 = sshll.u32 (!%p192_p9), %s632_s22, 1  ;;  %s216_s6 = sand.u32 (!%p192_p9), 1, %s569_s19  }
   0xe   : > { %195 = sbr.rel (%p192_p9) target bundleno = 445 (0x1bd), region = 40  ;;  %p220_p10 = scmp.lt.s32.totalorder (!%p192_p9), %s433_s7, 3 }
   0xf   : > { %s432_s9 = sshll.u32 (!%p192_p9), %s216_s6, 3  ;;  %s466_s10 = sshll.u32 (!%p192_p9), %s632_s22, 3 }
  0x10   : > { %s362_s13 = scalar_lea.hbm (!%p192_p9), %s725_s5, %s466_s10  ;;  %s218_s14 = scalar_lea.vmem (!%p192_p9), [#allocation2], %s432_s9 }
  0x11   : > { %s363_s15 = sshll.u32 (!%p192_p9), %s218_s14, 4  ;;  %s365_s16 = sshll.u32 (!%p192_p9), %s362_s13, 4  ;;  %s364_s15 = int_to_ptr.vmem [resolvable:$true] %s363_s15  ;;  %s366_s16 = int_to_ptr.hbm [resolvable:$true] %s365_s16 }
  0x12   : > { %s351_s22 = scalar_lea.sflag (!%p192_p9), [#allocation3], %s216_s6  ;;  %s535_s30 = scalar_lea.hbm (!%p192_p9), %s725_s5, 16 }
  0x13   : > { %v465_v0 = vld [vmem:[%s721_s1 + $0x18] sm:$0xff]  ;;  %v464_v1 = vld [vmem:[%s721_s1 + $0x10] sm:$0xff]  ;;  %s733_s7 = smov (!%p220_p10, %s433_s7), 3  ;;  %v463_v2 = vld [vmem:[%s721_s1 + $0x8] sm:$0xff]  ;;  %vm270_vm0 = vcmask 523264   ;;  %vm288_vm1 = vcmask 261120  }
  0x14   : > { %278 = vmatpush.bf16.msra.mxu0 %v465_v0  ;;  %s434_s12 = sshll.u32 %s733_s7, 2  ;;  %v462_v3 = vld [vmem:[%s721_s1] sm:$0xff]  ;;  %vm347_vm7 = vcmask 257024  }
  0x15   : > { %s223_s17 = scalar_lea.vmem %s720_s0, %s434_s12  ;;  %v508_v5 = vld [vmem:[%s722_s2] ss:$0 sm:$0xff] }
  0x16   : > { %v461_v4 = vld [vmem:[%s223_s17] sm:$0xff]  ;;  %s529_s17 = sshra.s32 %s366_s16, 4  ;;  %s530_s17 = int_to_ptr.hbm [resolvable:$true] %s529_s17 }
  0x17   : > { %v509_v36 = vld [vmem:[%s723_s3] ss:$0 sm:$0xff]  ;;  %s531_s23 = scalar_lea.hbm %s530_s17, 8  ;;  %p536_p0 = scmp.lt.s32.totalorder %s530_s17, %s725_s5 }
  0x18   : > { %279 = vmatpush.bf16.msra.mxu0 %v464_v1  ;;  %v510_v39 = vld [vmem:[%s724_s4] ss:$0 sm:$0xff]  ;;  %p532_p11 = scmp.ne.s32.totalorder %s530_s17, %s531_s23  ;;  %p537_p1 = scmp.lt.s32.totalorder %s535_s30, %s531_s23 }
  0x1a   : > { %p533_p12 = pnand %p532_p11, %p649_p5  ;;  %p538_p2 = por %p537_p1, %p536_p0 }
  0x1c   : > { %280 = vmatpush.bf16.msra.mxu0 %v463_v2  ;;  %p534_p13 = pneg %p533_p12 }
  0x1e   : > { %p539_p3 = pnand %p538_p2, %p534_p13 }
  0x20   : > { %281 = vmatpush.bf16.msra.mxu0 %v462_v3 }
  0x23   : > { %455 = vmatmul.msk.bf16.vlgmr.msra.gmra.mxu0 %vm270_vm0, %v461_v4 }
  0xa0   : > { %v283_v6 = vpop.f32.mrf.mxu0 }
  0xa1   : > { %v284_v7 = vadd.f32 %v508_v5, %v283_v6 }
  0xa3   : > { %v289_v8 = vsel %vm288_vm1, %v284_v7, 0.0 }
  0xa4   : > { %290 = vadd.xlane.f32.xlu0 %v289_v8 }
  0xa8   : > { %v285_v9 = vpop.f32.mrf.mxu0 }
  0xa9   : > { %v286_v10 = vadd.f32 %v508_v5, %v285_v9 }
  0xab   : > { %v292_v11 = vsel %vm288_vm1, %v286_v10, 0.0 }
  0xac   : > { %293 = vadd.xlane.f32.xlu0 %v292_v11 }
 0x117   : > { %v291_v12 = vpop.xlane.xlu0 %290 }
 0x118   : > { %v295_v13 = vmul.f32 0.03125, %v291_v12 }
 0x11a   : > { %v297_v14 = vsub.f32 %v284_v7, %v295_v13 }
 0x11c   : > { %v299_v15 = vmul.f32 %v297_v14, %v297_v14 }
 0x11e   : > { %v301_v16 = vsel %vm288_vm1, %v299_v15, 0.0 }
 0x11f   : > { %302 = vadd.xlane.f32.xlu1 %v301_v16  ;;  %v294_v17 = vpop.xlane.xlu0 %293 }
 0x120   : > { %v296_v18 = vmul.f32 0.03125, %v294_v17 }
 0x122   : > { %v298_v19 = vsub.f32 %v286_v10, %v296_v18 }
 0x124   : > { %v300_v20 = vmul.f32 %v298_v19, %v298_v19 }
 0x126   : > { %v304_v21 = vsel %vm288_vm1, %v300_v20, 0.0 }
 0x127   : > { %305 = vadd.xlane.f32.xlu1 %v304_v21 }
 0x192   : > { %v303_v22 = vpop.xlane.xlu1 %302 }
 0x193   : > { %v307_v23 = vmul.f32 0.03125, %v303_v22 }
 0x195   : > { %v309_v24 = vadd.f32 1e-05, %v307_v23 }
 0x197   : > { %511 = vrsqrt.f32 %v309_v24  ;;  %vm317_vm3 = vweird.f32 %v309_v24 }
 0x19a   : > { %v306_v25 = vpop.xlane.xlu1 %305 }
 0x19b   : > { %v308_v26 = vmul.f32 0.03125, %v306_v25 }
 0x19d   : > { %v512_v27 = vpop.eup %511  ;;  %v310_v28 = vadd.f32 1e-05, %v308_v26 }
 0x19e   : > { %v312_v29 = vmul.f32 %v512_v27, %v309_v24  ;;  %vm318_vm2 = vweird.f32 %v512_v27 }
 0x19f   : > { %513 = vrsqrt.f32 %v310_v28  ;;  %vm319_vm4 = vmor %vm317_vm3, %vm318_vm2  ;;  %vm327_vm6 = vweird.f32 %v310_v28 }
 0x1a0   : > { %v313_v30 = vmul.f32 %v512_v27, %v312_v29 }
 0x1a2   : > { %v314_v31 = vmul.f32 0.5, %v313_v30 }
 0x1a4   : > { %v315_v32 = vsub.f32 1.5, %v314_v31 }
 0x1a5   : > { %v514_v33 = vpop.eup %513 }
 0x1a6   : > { %v316_v34 = vmul.f32 %v512_v27, %v315_v32  ;;  %v322_v35 = vmul.f32 %v514_v33, %v310_v28  ;;  %vm328_vm5 = vweird.f32 %v514_v33 }
 0x1a7   : > { %vm329_vm8 = vmor %vm327_vm6, %vm328_vm5 }
 0x1a8   : > { %v320_v37 = vsel %vm319_vm4, %v512_v27, %v316_v34  ;;  %v323_v38 = vmul.f32 %v514_v33, %v322_v35 }
 0x1a9   : > { %v331_v40 = vmul.f32 %v320_v37, %v297_v14 }
 0x1aa   : > { %v324_v41 = vmul.f32 0.5, %v323_v38 }
 0x1ab   : > { %v337_v42 = vmul.f32 %v509_v36, %v331_v40 }
 0x1ac   : > { %v325_v43 = vsub.f32 1.5, %v324_v41 }
 0x1ad   : > { %v343_v44 = vadd.f32 %v510_v39, %v337_v42 }
 0x1ae   : > { %v326_v45 = vmul.f32 %v514_v33, %v325_v43 }
 0x1af   : > { %v345_v46 = vpack.c.bf16 %v343_v44, %v343_v44 }
 0x1b0   : > { %v330_v47 = vsel %vm329_vm8, %v514_v33, %v326_v45 }
 0x1b1   : > { %v332_v48 = vmul.f32 %v330_v47, %v298_v19  ;;  %348 = vst.msk [vmem:[%s218_s14] sm:$0xf] %vm347_vm7, %v345_v46 }
 0x1b3   : > { %v338_v49 = vmul.f32 %v509_v36, %v332_v48 }
 0x1b5   : > { %v344_v50 = vadd.f32 %v510_v39, %v338_v49 }
 0x1b7   : > { %v346_v51 = vpack.c.bf16 %v344_v50, %v344_v50 }
 0x1b9   : > { %349 = vst.msk [vmem:[%s218_s14 + $0x4] sm:$0xf] %vm347_vm7, %v346_v51 }
 0x1ba   : > { %542 = shalt.err (!%p539_p3)
}
 0x1bb   : > { %s579_s6 = smov 64   ;;  %s580_s9 = smov 4  }
 0x1bc   : > { %467 = dma.vmem_to_hbm [thread:$0]  (%p649_p5), %s364_s15, 128, %s366_s16, %s351_s22, %s579_s6, %s579_s6, %s580_s9  }
 0x1bd PF: > { %p473_p4 = scmp.ge.s32.totalorder %s577_s21, 2  ;;  %s380_s10 = sand.u32 1, %s565_s18  }
 0x1be   : > { %s381_s11 = scalar_lea.sflag [#allocation3], %s380_s10 }
 0x1bf   : > { %p470_p7 = pnand %p473_p4, %p653_p6 }
 0x1c1   : > { %p471_p8 = pneg %p470_p7 }
 0x1c3   : > { %560 = dma.done.wait (%p471_p8), %s381_s11, 128  }
 0x1c4   : > { %562 = vsyncadd (%p471_p8), %s381_s11, 4294967168  ;;  %p15_p9 = scmp.ge.s32.totalorder %s636_s24, 4   ;;  %s728_s18 = smov %s569_s19 }
 0x1c5   : > { %s729_s19 = smov %s573_s20  ;;  %s730_s20 = smov %s647_s27 }
 0x1c6   : > { %s731_s21 = smov %s636_s24  ;;  %17 = sbr.rel (!%p15_p9) target bundleno = 3 (0x3), region = 75 }
 0x1cb   :  { %387 = vsyncpa [#allocation3], 1 }
 0x1cc   :  { %389 = vsyncpa [#allocation3 + $0x1], 1 }

</bundles_post_ra>
